<compile_context>
chip_gen: v7x
topology: tpu7x:2x2x1
jax: 0.10.0
libtpu: 0.0.40
codegen_flags: <defaults>
</compile_context>

<pallas_src>
import jax
import jax.numpy as jnp
from jax.experimental import pallas as pl
from jax.experimental.pallas import tpu as pltpu


def _round_up(v, m):
    return ((v + m - 1) // m) * m


def _lane_pad(d):
    """Lane-dense feature padding: prefer 256 alignment (v6e/v7x MXU tile)
    when the extra zero padding over 128 alignment is <= 10%, else 128."""
    p128 = _round_up(d, 128)
    p256 = _round_up(d, 256)
    return p256 if (p256 - p128) <= 0.1 * d else p128


def _vmem_budget_bytes():
    """Physical VMEM capacity minus ~20% headroom for compiler scratch/spill."""
    try:
        cap = int(pltpu.get_tpu_info().vmem_capacity_bytes)
    except Exception:
        cap = 64 << 20  # conservative fallback: v7x per-TC VMEM
    return int(cap * 0.8)


def encoder_kernel(x_ref, w1_ref, b1_ref, w2_ref, b2_ref, o_ref, acc_ref):
    """One (batch-tile, hidden-chunk) grid step of fc2(relu(fc1(x)))."""
    k = pl.program_id(1)

    @pl.when(k == 0)
    def _():
        acc_ref[...] = jnp.zeros_like(acc_ref)

    # fc1 chunk: (tb, in_p) @ (in_p, hid_tile) -> fp32 on the MXU.
    h = jnp.dot(x_ref[...], w1_ref[...], preferred_element_type=jnp.float32)
    # Bias + ReLU epilogue in fp32 on the accumulator (VPU; safe on v5e).
    h = jnp.maximum(h + b1_ref[...].astype(jnp.float32), 0.0)
    # fc2 chunk: (tb, hid_tile) @ (hid_tile, out_p), accumulated in fp32.
    acc_ref[...] += jnp.dot(h.astype(w2_ref.dtype), w2_ref[...],
                            preferred_element_type=jnp.float32)

    @pl.when(k == pl.num_programs(1) - 1)
    def _():
        o_ref[...] = (acc_ref[...]
                      + b2_ref[...].astype(jnp.float32)).astype(o_ref.dtype)


def encoder_forward(x, w1, b1, w2, b2, *, block_b=256, compute_dtype=None):
    """x: (B, input_dim); w1: (input_dim, hidden); b1: (1, hidden);
    w2: (hidden, output_dim); b2: (1, output_dim).

    compute_dtype: optional dtype (e.g. jnp.bfloat16) for the matmul operands;
    accumulation and the bias/ReLU epilogue stay fp32."""
    B, in_dim = x.shape
    hidden = w1.shape[1]
    out_dim = w2.shape[1]
    out_dtype = x.dtype
    cdt = jnp.dtype(compute_dtype) if compute_dtype is not None else jnp.dtype(x.dtype)

    # Lane-dense feature dims (contracted dims MUST be real zero-padded).
    in_p = _lane_pad(in_dim)
    hid_p = _lane_pad(hidden)
    out_p = _lane_pad(out_dim)

    # Batch tiling: never pad the batch axis in HBM.  The ragged last tile is
    # handled by Pallas (OOB output rows are discarded; garbage input rows
    # only influence those discarded rows since all ops are row-wise in batch).
    tb = min(block_b, _round_up(B, 8))
    num_b = pl.cdiv(B, tb)
    # Megacore (v7x has 2 TensorCores): ensure >= 2 steps on the parallel axis
    # when the batch is large enough; harmless on single-TC v5e/v6e.
    if num_b < 2 and B >= 16:
        tb = _round_up(pl.cdiv(B, 2), 8)
        num_b = pl.cdiv(B, tb)

    def pad2(a, rows, cols):
        pr, pc = rows - a.shape[0], cols - a.shape[1]
        if pr or pc:
            a = jnp.pad(a, ((0, pr), (0, pc)))
        return a

    xp = pad2(x, B, in_p).astype(cdt)
    w1p = pad2(w1, in_p, hid_p).astype(cdt)
    b1p = pad2(b1, 1, hid_p)                      # biases stay fp32
    w2p = pad2(w2, hid_p, out_p).astype(cdt)
    b2p = pad2(b2, 1, out_p)

    itemsize = cdt.itemsize
    b_item = jnp.dtype(b1p.dtype).itemsize
    budget = _vmem_budget_bytes()

    def footprint(ht):
        # Every pipelined input is double-buffered by default -> count 2x.
        return (2 * tb * in_p * itemsize            # x tile
                + 2 * in_p * ht * itemsize          # w1 chunk
                + 2 * ht * b_item                   # b1 chunk
                + 2 * ht * out_p * itemsize         # w2 chunk
                + 2 * out_p * b_item                # b2
                + 2 * tb * out_p * out_dtype.itemsize   # out tile
                + tb * out_p * 4                    # fp32 accumulator scratch
                + tb * ht * 4                       # live fp32 intermediate
                + (2 << 20))                        # compiler headroom

    # Hidden-dim chunk: keep the full weights resident when they fit,
    # otherwise pick the largest 128-multiple divisor of hid_p that fits.
    hid_tile = hid_p
    if footprint(hid_tile) > budget:
        for cand in range(hid_p - 128, 0, -128):
            if hid_p % cand == 0 and footprint(cand) <= budget:
                hid_tile = cand
                break
        else:
            hid_tile = 128
    num_h = hid_p // hid_tile

    vmem_limit = int(min(max(footprint(hid_tile), 32 << 20), budget))

    # Honest cost estimate (MXU work on padded lanes + ragged batch tail,
    # weight re-streaming per batch tile when chunked, wrapper pad/slice
    # copies around the call).
    rows = num_b * tb
    flops = int(2 * rows * (in_p * hid_p + hid_p * out_p))
    weight_bytes = (w1p.size + w2p.size) * itemsize + (b1p.size + b2p.size) * b_item
    weight_fetches = 1 if num_h == 1 else num_b
    bytes_accessed = int(
        xp.size * itemsize                          # kernel reads x
        + weight_bytes * weight_fetches             # kernel reads weights
        + B * out_p * out_dtype.itemsize            # kernel writes out
        + x.size * x.dtype.itemsize                 # wrapper pad/cast (read)
        + xp.size * itemsize                        # wrapper pad/cast (write)
        + 2 * B * out_dim * out_dtype.itemsize)     # output slice copy

    out_padded = pl.pallas_call(
        encoder_kernel,
        out_shape=jax.ShapeDtypeStruct((B, out_p), out_dtype),
        grid=(num_b, num_h),
        in_specs=[
            pl.BlockSpec((tb, in_p), lambda i, k: (i, 0)),         # x: batch tile
            pl.BlockSpec((in_p, hid_tile), lambda i, k: (0, k)),   # w1 chunk
            pl.BlockSpec((1, hid_tile), lambda i, k: (0, k)),      # b1 chunk
            pl.BlockSpec((hid_tile, out_p), lambda i, k: (k, 0)),  # w2 chunk
            pl.BlockSpec((1, out_p), lambda i, k: (0, 0)),         # b2
        ],
        out_specs=pl.BlockSpec((tb, out_p), lambda i, k: (i, 0)),
        scratch_shapes=[pltpu.VMEM((tb, out_p), jnp.float32)],
        compiler_params=pltpu.CompilerParams(
            dimension_semantics=("parallel", "arbitrary"),
            vmem_limit_bytes=vmem_limit,
        ),
        cost_estimate=pl.CostEstimate(
            flops=flops, transcendentals=0, bytes_accessed=bytes_accessed),
    )(xp, w1p, b1p, w2p, b2p)

    # Strip feature padding (batch axis was never padded).
    return out_padded[:, :out_dim]


def init_encoder_params(key, input_dim, hidden, output_dim, dtype=jnp.float32):
    # Deterministic init mimicking nn.Linear default: U(-1/sqrt(fan_in), ...).
    k1, k2, k3, k4 = jax.random.split(key, 4)
    bound1 = 1.0 / jnp.sqrt(input_dim)
    bound2 = 1.0 / jnp.sqrt(hidden)
    # Stored as (in_features, out_features) — i.e. PyTorch weight transposed.
    w1 = jax.random.uniform(k1, (input_dim, hidden), dtype, -bound1, bound1)
    b1 = jax.random.uniform(k2, (1, hidden), dtype, -bound1, bound1)
    w2 = jax.random.uniform(k3, (hidden, output_dim), dtype, -bound2, bound2)
    b2 = jax.random.uniform(k4, (1, output_dim), dtype, -bound2, bound2)
    return w1, b1, w2, b2


def encoder_ref(x, w1, b1, w2, b2):
    # Pure-JAX reference for correctness check.
    h = jnp.maximum(x @ w1 + b1, 0.0)
    return h @ w2 + b2


if __name__ == "__main__":
    key = jax.random.PRNGKey(0)

    # --- Test 1: small shapes, fp32 end-to-end.
    batch, input_dim, hidden, output_dim = 8, 32, 64, 16
    kx, kp, kx2, kp2 = jax.random.split(key, 4)
    x = jax.random.normal(kx, (batch, input_dim), jnp.float32)
    w1, b1, w2, b2 = init_encoder_params(kp, input_dim, hidden, output_dim)

    fwd = jax.jit(encoder_forward)
    out = jax.block_until_ready(fwd(x, w1, b1, w2, b2))
    ref = encoder_ref(x, w1, b1, w2, b2)
    assert out.shape == (batch, output_dim)
    assert jnp.allclose(out, ref, atol=1e-5, rtol=1e-5)

    # --- Test 2: non-aligned dims, batch large enough for a 2-step ragged
    # batch grid (exercises the no-batch-pad path + megacore split).
    B2, in2, hid2, out2_d = 40, 100, 300, 50
    x2 = jax.random.normal(kx2, (B2, in2), jnp.float32)
    p2 = init_encoder_params(kp2, in2, hid2, out2_d)
    out2 = jax.block_until_ready(jax.jit(encoder_forward)(x2, *p2))
    ref2 = encoder_ref(x2, *p2)
    assert out2.shape == (B2, out2_d)
    assert jnp.allclose(out2, ref2, atol=1e-4, rtol=1e-4)

    # --- Test 3: bf16 operands (fp32 accumulation/epilogue), loose tolerance.
    fwd_bf16 = jax.jit(
        lambda *a: encoder_forward(*a, compute_dtype=jnp.bfloat16))
    out_bf16 = jax.block_until_ready(fwd_bf16(x, w1, b1, w2, b2))
    assert out_bf16.shape == (batch, output_dim)
    assert jnp.allclose(out_bf16, ref, atol=5e-2, rtol=5e-2)

    print("KERNEL_OK")
</pallas_src>

<mosaic_0001>
module attributes {stable_mosaic.version = 11 : i64} {
  func.func @encoder_kernel(%arg0: i32, %arg1: i32, %arg2: memref<8x128xf32, #tpu.memory_space<vmem>>, %arg3: memref<128x128xf32, #tpu.memory_space<vmem>>, %arg4: memref<1x128xf32, #tpu.memory_space<vmem>>, %arg5: memref<128x128xf32, #tpu.memory_space<vmem>>, %arg6: memref<1x128xf32, #tpu.memory_space<vmem>>, %arg7: memref<8x128xf32, #tpu.memory_space<vmem>>, %arg8: memref<8x128xf32, #tpu.memory_space<vmem>>) attributes {dimension_semantics = [#tpu.dimension_semantics<parallel>, #tpu.dimension_semantics<arbitrary>], iteration_bounds = array<i64: 1, 1>, scalar_prefetch = 0 : i64, scratch_operands = 1 : i64, tpu.core_type = #tpu.core_type<tc>, window_params = [{transform_indices = @transform_0, window_bounds = array<i64: 8, 128>}, {transform_indices = @transform_1, window_bounds = array<i64: 128, 128>}, {transform_indices = @transform_2, window_bounds = array<i64: 1, 128>}, {transform_indices = @transform_3, window_bounds = array<i64: 128, 128>}, {pipeline_mode = #tpu.pipeline_mode<synchronous>, transform_indices = @transform_4, window_bounds = array<i64: 1, 128>}, {transform_indices = @transform_5, window_bounds = array<i64: 8, 128>}]} {
    %c0_i32 = arith.constant 0 : i32
    %0 = arith.cmpi eq, %arg1, %c0_i32 : i32
    %1 = arith.extui %0 : i1 to i32
    %c0_i32_0 = arith.constant 0 : i32
    %2 = arith.cmpi ne, %1, %c0_i32_0 : i32
    scf.if %2 {
      %cst_16 = arith.constant 0.000000e+00 : f32
      %19 = vector.broadcast %cst_16 : f32 to vector<8x128xf32>
      %c0_17 = arith.constant 0 : index
      %c0_18 = arith.constant 0 : index
      %20 = vector.load %arg8[%c0_17, %c0_18] : memref<8x128xf32, #tpu.memory_space<vmem>>, vector<8x128xf32>
      tpu.vector_store %arg8[%c0_17, %c0_18], %19 {strides = array<i32>} : memref<8x128xf32, #tpu.memory_space<vmem>>, vector<8x128xf32>,
    } else {
    }
    %c0 = arith.constant 0 : index
    %c0_1 = arith.constant 0 : index
    %3 = vector.load %arg2[%c0, %c0_1] : memref<8x128xf32, #tpu.memory_space<vmem>>, vector<8x128xf32>
    %c0_2 = arith.constant 0 : index
    %c0_3 = arith.constant 0 : index
    %4 = vector.load %arg3[%c0_2, %c0_3] : memref<128x128xf32, #tpu.memory_space<vmem>>, vector<128x128xf32>
    %cst = arith.constant dense<0.000000e+00> : vector<8x128xf32>
    %5 = tpu.matmul %3, %4, %cst {dimension_numbers = #tpu.dot_dimension_numbers<[1], [0], [0], [1], [0, 0, 1, 1], [], []>} : vector<8x128xf32>, vector<128x128xf32>, vector<8x128xf32> -> vector<8x128xf32>
    %c0_4 = arith.constant 0 : index
    %c0_5 = arith.constant 0 : index
    %6 = vector.load %arg4[%c0_4, %c0_5] : memref<1x128xf32, #tpu.memory_space<vmem>>, vector<1x128xf32>
    %7 = vector.broadcast %6 : vector<1x128xf32> to vector<8x128xf32>
    %8 = arith.addf %5, %7 : vector<8x128xf32>
    %cst_6 = arith.constant 0.000000e+00 : f32
    %9 = vector.broadcast %cst_6 : f32 to vector<8x128xf32>
    %10 = arith.maximumf %8, %9 : vector<8x128xf32>
    %c0_7 = arith.constant 0 : index
    %c0_8 = arith.constant 0 : index
    %11 = vector.load %arg8[%c0_7, %c0_8] : memref<8x128xf32, #tpu.memory_space<vmem>>, vector<8x128xf32>
    %c0_9 = arith.constant 0 : index
    %c0_10 = arith.constant 0 : index
    %12 = vector.load %arg5[%c0_9, %c0_10] : memref<128x128xf32, #tpu.memory_space<vmem>>, vector<128x128xf32>
    %cst_11 = arith.constant dense<0.000000e+00> : vector<8x128xf32>
    %13 = tpu.matmul %10, %12, %cst_11 {dimension_numbers = #tpu.dot_dimension_numbers<[1], [0], [0], [1], [0, 0, 1, 1], [], []>} : vector<8x128xf32>, vector<128x128xf32>, vector<8x128xf32> -> vector<8x128xf32>
    %14 = arith.addf %11, %13 : vector<8x128xf32>
    %c0_12 = arith.constant 0 : index
    %c0_13 = arith.constant 0 : index
    %15 = vector.load %arg8[%c0_12, %c0_13] : memref<8x128xf32, #tpu.memory_space<vmem>>, vector<8x128xf32>
    tpu.vector_store %arg8[%c0_12, %c0_13], %14 {strides = array<i32>} : memref<8x128xf32, #tpu.memory_space<vmem>>, vector<8x128xf32>,
    %c0_i32_14 = arith.constant 0 : i32
    %16 = arith.cmpi eq, %arg1, %c0_i32_14 : i32
    %17 = arith.extui %16 : i1 to i32
    %c0_i32_15 = arith.constant 0 : i32
    %18 = arith.cmpi ne, %17, %c0_i32_15 : i32
    scf.if %18 {
      %c0_16 = arith.constant 0 : index
      %c0_17 = arith.constant 0 : index
      %19 = vector.load %arg8[%c0_16, %c0_17] : memref<8x128xf32, #tpu.memory_space<vmem>>, vector<8x128xf32>
      %c0_18 = arith.constant 0 : index
      %c0_19 = arith.constant 0 : index
      %20 = vector.load %arg6[%c0_18, %c0_19] : memref<1x128xf32, #tpu.memory_space<vmem>>, vector<1x128xf32>
      %21 = vector.broadcast %20 : vector<1x128xf32> to vector<8x128xf32>
      %22 = arith.addf %19, %21 : vector<8x128xf32>
      %c0_20 = arith.constant 0 : index
      %c0_21 = arith.constant 0 : index
      %23 = vector.load %arg7[%c0_20, %c0_21] : memref<8x128xf32, #tpu.memory_space<vmem>>, vector<8x128xf32>
      tpu.vector_store %arg7[%c0_20, %c0_21], %22 {strides = array<i32>} : memref<8x128xf32, #tpu.memory_space<vmem>>, vector<8x128xf32>,
    } else {
    }
    return
  }
  func.func @transform_0(%arg0: i32, %arg1: i32) -> (i32, i32) {
    %c0_i32 = arith.constant 0 : i32
    %c0_i32_0 = arith.constant 0 : i32
    return %arg0, %c0_i32 : i32, i32
  }
  func.func @transform_1(%arg0: i32, %arg1: i32) -> (i32, i32) {
    %c0_i32 = arith.constant 0 : i32
    %c0_i32_0 = arith.constant 0 : i32
    return %c0_i32, %arg1 : i32, i32
  }
  func.func @transform_2(%arg0: i32, %arg1: i32) -> (i32, i32) {
    %c0_i32 = arith.constant 0 : i32
    %c0_i32_0 = arith.constant 0 : i32
    return %c0_i32, %arg1 : i32, i32
  }
  func.func @transform_3(%arg0: i32, %arg1: i32) -> (i32, i32) {
    %c0_i32 = arith.constant 0 : i32
    %c0_i32_0 = arith.constant 0 : i32
    return %arg1, %c0_i32 : i32, i32
  }
  func.func @transform_4(%arg0: i32, %arg1: i32) -> (i32, i32) {
    %c0_i32 = arith.constant 0 : i32
    %c0_i32_0 = arith.constant 0 : i32
    %c0_i32_1 = arith.constant 0 : i32
    return %c0_i32, %c0_i32_0 : i32, i32
  }
  func.func @transform_5(%arg0: i32, %arg1: i32) -> (i32, i32) {
    %c0_i32 = arith.constant 0 : i32
    %c0_i32_0 = arith.constant 0 : i32
    return %arg0, %c0_i32 : i32, i32
  }
}

</mosaic_0001>

<bundles_post_ra>
// kernel: encoder_forward.1
= control target key start
LH: loop header
LB: loop body
LE: loop exit
PB: predicated region body
PF: predicated region fallthrough
CT: control target
= control target key end

     0   :  { %v419_v3 = vmov 0.0|0.0   ;;  %vm420_vm0 = vmmov 0   ;;  %v421_v6 = vmov 0.0   ;;  %s586_s0 = inlined_call_operand.vmem [shape: f32[8,128], index: 0, kind: input, shape index: {}]   ;;  %s587_s1 = inlined_call_operand.vmem [shape: f32[128,128], index: 1, kind: input, shape index: {}]   ;;  %s588_s2 = inlined_call_operand.vmem [shape: f32[1,128], index: 2, kind: input, shape index: {}]   ;;  %s589_s3 = inlined_call_operand.vmem [shape: f32[128,128], index: 3, kind: input, shape index: {}]   ;;  %s590_s4 = inlined_call_operand.vmem [shape: f32[1,128], index: 4, kind: input, shape index: {}]   ;;  %s591_s5 = inlined_call_operand.hbm [shape: f32[8,128], index: 5, kind: output, shape index: {}]  }
   0x1   :  { %v27_v0 = vld [vmem:[%s587_s1] sm:$0xff]  ;;  %v28_v1 = vld [vmem:[%s587_s1 + $0x8] sm:$0xff]  ;;  %v29_v2 = vld [vmem:[%s587_s1 + $0x10] sm:$0xff]  ;;  %343 = vmatprep.subr.bf16.mxu0 %v419_v3  ;;  %305 = vmatprep.mubr.msk.f32.mxu0 %vm420_vm0, %v421_v6 }
   0x2   :  { %v344_v4 = vpack.c.bf16 %v28_v1, %v27_v0  ;;  %v30_v5 = vld [vmem:[%s587_s1 + $0x18] sm:$0xff]  ;;  %367 = vmatprep.subr.bf16.mxu1 %v419_v3  ;;  %340 = vmatprep.mubr.msk.f32.mxu1 %vm420_vm0, %v421_v6  ;;  %v31_v8 = vld [vmem:[%s587_s1 + $0x20] sm:$0xff]  ;;  %v32_v9 = vld [vmem:[%s587_s1 + $0x28] sm:$0xff] }
   0x3   :  { %v347_v7 = vpack.c.bf16 %v30_v5, %v29_v2  ;;  %v122_v10 = vld [vmem:[%s589_s3] sm:$0xff]  ;;  %v123_v11 = vld [vmem:[%s589_s3 + $0x8] sm:$0xff]  ;;  %v124_v12 = vld [vmem:[%s589_s3 + $0x10] sm:$0xff]  ;;  %v350_v14 = vpack.c.bf16 %v32_v9, %v31_v8 }
   0x4   :  { %345 = vmatpush3.bf16.msra.mxu0 %v344_v4  ;;  %v125_v13 = vld [vmem:[%s589_s3 + $0x18] sm:$0xff]  ;;  %v368_v15 = vpack.c.bf16 %v123_v11, %v122_v10  ;;  %v33_v16 = vld [vmem:[%s587_s1 + $0x30] sm:$0xff]  ;;  %v126_v19 = vld [vmem:[%s589_s3 + $0x20] sm:$0xff] }
   0x5   :  { %346 = vmatprep.subr.bf16.mxu0 %v419_v3  ;;  %v34_v17 = vld [vmem:[%s587_s1 + $0x38] sm:$0xff]  ;;  %v371_v18 = vpack.c.bf16 %v125_v13, %v124_v12  ;;  %v127_v20 = vld [vmem:[%s589_s3 + $0x28] sm:$0xff] }
   0x6   :  { %369 = vmatpush3.bf16.msra.mxu1 %v368_v15 }
   0x7   :  { %370 = vmatprep.subr.bf16.mxu1 %v419_v3 }
   0x8   :  { %348 = vmatpush3.bf16.msra.mxu0 %v347_v7 }
   0x9   :  { %349 = vmatprep.subr.bf16.mxu0 %v419_v3 }
   0xa   :  { %10 = vsyncpa [#allocation4], 0  ;;  %v353_v21 = vpack.c.bf16 %v34_v17, %v33_v16  ;;  %v35_v22 = vld [vmem:[%s587_s1 + $0x40] sm:$0xff]  ;;  %v36_v23 = vld [vmem:[%s587_s1 + $0x48] sm:$0xff]  ;;  %372 = vmatpush3.bf16.msra.mxu1 %v371_v18  ;;  %v374_v24 = vpack.c.bf16 %v127_v20, %v126_v19  ;;  %s422_s11 = smov [#allocation3]  }
   0xb   :  { %373 = vmatprep.subr.bf16.mxu1 %v419_v3  ;;  %v128_v25 = vld [vmem:[%s589_s3 + $0x30] sm:$0xff]  ;;  %v129_v26 = vld [vmem:[%s589_s3 + $0x38] sm:$0xff]  ;;  %v356_v27 = vpack.c.bf16 %v36_v23, %v35_v22  ;;  %v130_v31 = vld [vmem:[%s589_s3 + $0x40] sm:$0xff]  ;;  %s229_s12 = sshll.u32 %s422_s11, 4  ;;  %s230_s12 = int_to_ptr.vmem [resolvable:$true] %s229_s12 }
   0xc   :  { %351 = vmatpush3.bf16.msra.mxu0 %v350_v14  ;;  %v37_v28 = vld [vmem:[%s587_s1 + $0x50] sm:$0xff]  ;;  %v38_v29 = vld [vmem:[%s587_s1 + $0x58] sm:$0xff]  ;;  %v377_v30 = vpack.c.bf16 %v129_v26, %v128_v25  ;;  %v131_v32 = vld [vmem:[%s589_s3 + $0x48] sm:$0xff]  ;;  %p400_p1 = scmp.lt.s32.totalorder %s230_s12, %s230_s12 }
   0xd   :  { %352 = vmatprep.subr.bf16.mxu0 %v419_v3  ;;  %v359_v33 = vpack.c.bf16 %v38_v29, %v37_v28  ;;  %v39_v34 = vld [vmem:[%s587_s1 + $0x60] sm:$0xff]  ;;  %v40_v35 = vld [vmem:[%s587_s1 + $0x68] sm:$0xff]  ;;  %v380_v36 = vpack.c.bf16 %v131_v32, %v130_v31  ;;  %v132_v37 = vld [vmem:[%s589_s3 + $0x50] sm:$0xff] }
   0xe   :  { %375 = vmatpush3.bf16.msra.mxu1 %v374_v24  ;;  %v133_v38 = vld [vmem:[%s589_s3 + $0x58] sm:$0xff]  ;;  %v362_v39 = vpack.c.bf16 %v40_v35, %v39_v34  ;;  %v41_v40 = vld [vmem:[%s587_s1 + $0x70] sm:$0xff]  ;;  %v134_v43 = vld [vmem:[%s589_s3 + $0x60] sm:$0xff] }
   0xf   :  { %376 = vmatprep.subr.bf16.mxu1 %v419_v3  ;;  %v42_v41 = vld [vmem:[%s587_s1 + $0x78] sm:$0xff]  ;;  %v383_v42 = vpack.c.bf16 %v133_v38, %v132_v37  ;;  %v135_v44 = vld [vmem:[%s589_s3 + $0x68] sm:$0xff]  ;;  %v26_v47 = vld [vmem:[%s586_s0] sm:$0xff] }
  0x10   :  { %354 = vmatpush3.bf16.msra.mxu0 %v353_v21  ;;  %v365_v45 = vpack.c.bf16 %v42_v41, %v41_v40  ;;  %v386_v46 = vpack.c.bf16 %v135_v44, %v134_v43  ;;  %v136_v48 = vld [vmem:[%s589_s3 + $0x70] sm:$0xff]  ;;  %v137_v49 = vld [vmem:[%s589_s3 + $0x78] sm:$0xff]  ;;  %v237_v51 = vld [vmem:[%s588_s2] ss:$0 sm:$0xff]  ;;  %s395_s3 = scalar_lea.vmem %s230_s12, 128 }
  0x11   :  { %355 = vmatprep.subr.bf16.mxu0 %v419_v3  ;;  %v389_v50 = vpack.c.bf16 %v137_v49, %v136_v48  ;;  %v238_v56 = vld [vmem:[%s590_s4] ss:$0 sm:$0xff]  ;;  %p396_p0 = scmp.ne.s32.totalorder %s230_s12, %s395_s3  ;;  %p401_p2 = scmp.lt.s32.totalorder %s395_s3, %s395_s3 }
  0x12   :  { %378 = vmatpush3.bf16.msra.mxu1 %v377_v30 }
  0x13   :  { %379 = vmatprep.subr.bf16.mxu1 %v419_v3  ;;  %p402_p3 = por %p401_p2, %p400_p1 }
  0x14   :  { %357 = vmatpush3.bf16.msra.mxu0 %v356_v27 }
  0x15   :  { %358 = vmatprep.subr.bf16.mxu0 %v419_v3  ;;  %p403_p4 = pnand %p402_p3, %p396_p0 }
  0x16   :  { %381 = vmatpush3.bf16.msra.mxu1 %v380_v36 }
  0x17   :  { %382 = vmatprep.subr.bf16.mxu1 %v419_v3 }
  0x18   :  { %360 = vmatpush3.bf16.msra.mxu0 %v359_v33 }
  0x19   :  { %361 = vmatprep.subr.bf16.mxu0 %v419_v3 }
  0x1a   :  { %384 = vmatpush3.bf16.msra.mxu1 %v383_v42 }
  0x1b   :  { %385 = vmatprep.subr.bf16.mxu1 %v419_v3 }
  0x1c   :  { %363 = vmatpush3.bf16.msra.mxu0 %v362_v39 }
  0x1d   :  { %364 = vmatprep.subr.bf16.mxu0 %v419_v3 }
  0x1e   :  { %387 = vmatpush3.bf16.msra.mxu1 %v386_v46 }
  0x1f   :  { %388 = vmatprep.subr.bf16.mxu1 %v419_v3 }
  0x20   :  { %366 = vmatpush3.bf16.msra.mxu0 %v365_v45 }
  0x22   :  { %390 = vmatpush3.bf16.msra.mxu1 %v389_v50 }
  0x23   :  { %306 = vmatmul.mubr.f32.vlgmr.msra.gmra.mrb[0].mxu0 %v26_v47 }
  0xf6   :  { %v116_v52 = vpop.f32.mrb[0].mxu0 }
  0xf7   :  { %v117_v53 = vadd.f32 %v237_v51, %v116_v52  ;;  %v307_v54 = vpop.f32.mrb[1].mxu0 }
  0xf9   :  { %v120_v55 = vmax.f32 %v117_v53, 0.0 }
  0xfb   :  { %341 = vmatmul.mubr.f32.vlgmr.msra.gmra.mrb[0].mxu1 %v120_v55 }
 0x1ce   :  { %v204_v57 = vpop.f32.mrb[0].mxu1 }
 0x1cf   :  { %v221_v58 = vadd.f32 %v238_v56, %v204_v57  ;;  %v342_v59 = vpop.f32.mrb[1].mxu1 }
 0x1d1   :  { %222 = vst [vmem:[#allocation3] sm:$0xff] %v221_v58 }
 0x1d2   :  { %406 = shalt.err (!%p403_p4)
}
 0x1d3   :  { %s407_s14 = scalar_lea.hbm %s591_s5, 128 }
 0x1d4   :  { %p408_p5 = scmp.ne.s32.totalorder %s591_s5, %s407_s14  ;;  %p411_p6 = scmp.lt.u32.totalorder %s407_s14, %s591_s5 }
 0x1d6   :  { %p413_p7 = pnand %p411_p6, %p408_p5 }
 0x1d8   :  { %416 = shalt.err (!%p413_p7)
}
 0x1d9   :  { %232 = dma.vmem_to_hbm [thread:$0]  %s230_s12, 128, %s591_s5, [#allocation4]  }
 0x1da   :  { %417 = dma.done.wait [#allocation4], 128  }
 0x1db   :  { %418 = vsyncadd [#allocation4], 4294967168 }
 0x1dc   :  { %236 = vsyncpa [#allocation4], 1 }

</bundles_post_ra>
